<compile_context>
chip_gen: v5e
topology: v5e:2x2
jax: 0.10.0
libtpu: 0.0.40
codegen_flags: <defaults>
</compile_context>

<pallas_src>
from math import floor

import jax
import jax.numpy as jnp
from jax.experimental import pallas as pl
from jax.experimental.pallas import tpu as pltpu


def mbinet_kernel(x_ref, w1_ref, b1_ref, w2_ref, b2_ref, w3_ref, b3_ref, o_ref):
    """Fused top_net forward for one batch tile:
       Linear -> ReLU -> (Dropout=id) -> Linear -> ReLU -> (Dropout=id)
       -> Linear -> softmax."""
    h1 = jnp.dot(x_ref[...], w1_ref[...],
                 preferred_element_type=jnp.float32) + b1_ref[...]
    h1 = jnp.maximum(h1, 0.0)

    h2 = jnp.dot(h1, w2_ref[...],
                 preferred_element_type=jnp.float32) + b2_ref[...]
    h2 = jnp.maximum(h2, 0.0)

    logits = jnp.dot(h2, w3_ref[...],
                     preferred_element_type=jnp.float32) + b3_ref[...]

    # Numerically stable softmax over the class axis. Exact divide: the (tb, 3)
    # tensor is tiny, and exact division keeps torch.softmax parity (rows sum to 1).
    m = jnp.max(logits, axis=-1, keepdims=True)
    e = jnp.exp(logits - m)
    s = jnp.sum(e, axis=-1, keepdims=True)
    o_ref[...] = (e / s).astype(o_ref.dtype)


def mbinet_reference(x_static, x_threshold, params):
    """Pure-JAX reference matching the PyTorch module's forward (inference mode)."""
    w1, b1, w2, b2, w3, b3 = params
    x = jnp.concatenate([x_static, x_threshold], axis=1)
    h1 = jnp.maximum(x @ w1 + b1, 0.0)
    h2 = jnp.maximum(h1 @ w2 + b2, 0.0)
    logits = h2 @ w3 + b3
    return jax.nn.softmax(logits, axis=-1)


def mbinet_forward(x_static, x_threshold, params, *, block_batch=2048,
                   compute_dtype=jnp.bfloat16, use_pallas=None):
    """Fused MBINet top_net + softmax as one Pallas kernel, tiling the batch.

    use_pallas=None -> auto-dispatch: small batches take the pure-JAX path (the
    pallas_call launch overhead dwarfs the work there); True forces the kernel.
    """
    w1, b1, w2, b2, w3, b3 = params

    B, Ds = x_static.shape
    Dt = x_threshold.shape[1]
    D = Ds + Dt
    H = w1.shape[1]
    C = w3.shape[1]
    assert w1.shape[0] == D

    if use_pallas is None:
        use_pallas = B >= 1024
    if not use_pallas:
        return mbinet_reference(x_static, x_threshold, params)

    # One fused concat + cast pass (XLA fuses these); ideally the producer hands us
    # the concatenated low-precision activation directly.
    x = jnp.concatenate([x_static, x_threshold], axis=1).astype(compute_dtype)
    w1c = w1.astype(compute_dtype)

    in_bytes = jnp.dtype(compute_dtype).itemsize
    sub = 16 if in_bytes < 4 else 8  # sublane multiple (packed dtypes want 16)

    if B >= 2 * sub:
        # Large tile to amortize per-step overhead, but keep >= 2 batch tiles so
        # both v7x TensorCores get work (dimension_semantics=("parallel",)).
        tb = min(block_batch, pl.cdiv(pl.cdiv(B, 2), sub) * sub)
    else:
        tb = B  # single full-extent block
    grid = (pl.cdiv(B, tb),)

    # Rough per-tile VMEM (lane-padded to 128; double-buffered input/output streams
    # plus f32 temporaries). Raise the scoped limit with headroom, capped well under
    # v7x's 64 MiB physical VMEM.
    tile_vmem = tb * 128 * (2 * in_bytes + 2 * 4 + 3 * 4)
    vmem_limit = int(min(max(2 * tile_vmem, 32 << 20), 60 << 20))

    cost = pl.CostEstimate(
        flops=2 * B * (D * H + H * H + H * C),
        transcendentals=B * C,
        bytes_accessed=B * (D * in_bytes + C * 4)
        + D * H * in_bytes + (H * H + H * C + 2 * H + C) * 4,
    )

    full = lambda shape: pl.BlockSpec(shape, lambda i: (0, 0))

    # Note: B % tb != 0 is fine -- the trailing partial block's out-of-bounds rows are
    # garbage in VMEM but softmax is row-independent and those rows are never written
    # back to HBM.
    out = pl.pallas_call(
        mbinet_kernel,
        out_shape=jax.ShapeDtypeStruct((B, C), jnp.float32),
        grid=grid,
        in_specs=[
            pl.BlockSpec((tb, D), lambda i: (i, 0)),   # merged activation tile
            full((D, H)), full((1, H)),                # layer 1
            full((H, H)), full((1, H)),                # layer 2
            full((H, C)), full((1, C)),                # layer 3
        ],
        out_specs=pl.BlockSpec((tb, C), lambda i: (i, 0)),
        compiler_params=pltpu.CompilerParams(
            dimension_semantics=("parallel",),   # batch tiles split across TCs on v7x
            vmem_limit_bytes=vmem_limit,
        ),
        cost_estimate=cost,
    )(x, w1c, b1, w2, b2, w3, b3)

    return out


def init_params(key, n_static, n_threshold, hidden_dim, n_classes):
    """Deterministic nn.Linear-style (uniform +/- 1/sqrt(fan_in)) init."""
    total_input_dim = n_static + n_threshold

    def linear(key, fan_in, fan_out):
        kw, kb = jax.random.split(key)
        bound = 1.0 / jnp.sqrt(jnp.float32(fan_in))
        w = jax.random.uniform(kw, (fan_in, fan_out), jnp.float32, -bound, bound)
        b = jax.random.uniform(kb, (1, fan_out), jnp.float32, -bound, bound)
        return w, b

    k1, k2, k3 = jax.random.split(key, 3)
    w1, b1 = linear(k1, total_input_dim, hidden_dim)
    w2, b2 = linear(k2, hidden_dim, hidden_dim)
    w3, b3 = linear(k3, hidden_dim, n_classes)
    return (w1, b1, w2, b2, w3, b3)


if __name__ == "__main__":
    # Small shapes consistent with the module.
    batch = 8
    n_static = 20
    n_threshold = 12
    n_classes = 3

    total_input_dim = n_static + n_threshold            # 32
    hidden_dim = min(floor(total_input_dim / 2), 64)    # 16

    key = jax.random.PRNGKey(0)
    k_s, k_t, k_p, k_s2, k_t2 = jax.random.split(key, 5)

    x_static = jax.random.normal(k_s, (batch, n_static), jnp.float32)
    x_threshold = jax.random.normal(k_t, (batch, n_threshold), jnp.float32)
    params = init_params(k_p, n_static, n_threshold, hidden_dim, n_classes)

    # 1) Exact-parity path (f32 activations), tiny batch, single full-extent block.
    out = mbinet_forward(x_static, x_threshold, params,
                         compute_dtype=jnp.float32, use_pallas=True)
    out = jax.block_until_ready(out)
    ref = mbinet_reference(x_static, x_threshold, params)
    assert out.shape == (batch, n_classes)
    assert bool(jnp.all(jnp.abs(jnp.sum(out, axis=1) - 1.0) < 1e-5))
    assert bool(jnp.max(jnp.abs(out - ref)) < 5e-3)

    # 2) Perf-default path (bf16 activations), multiple tiles + partial tail block.
    batch2 = 200
    xs2 = jax.random.normal(k_s2, (batch2, n_static), jnp.float32)
    xt2 = jax.random.normal(k_t2, (batch2, n_threshold), jnp.float32)
    out2 = mbinet_forward(xs2, xt2, params, block_batch=64, use_pallas=True)
    out2 = jax.block_until_ready(out2)
    ref2 = mbinet_reference(xs2, xt2, params)
    assert out2.shape == (batch2, n_classes)
    assert bool(jnp.all(jnp.abs(jnp.sum(out2, axis=1) - 1.0) < 1e-5))
    assert bool(jnp.max(jnp.abs(out2 - ref2)) < 2e-2)

    print("KERNEL_OK")
</pallas_src>

<mosaic_0001>
module attributes {stable_mosaic.version = 11 : i64} {
  func.func @mbinet_kernel(%arg0: i32, %arg1: memref<8x32xf32, #tpu.memory_space<vmem>>, %arg2: memref<32x16xf32, #tpu.memory_space<vmem>>, %arg3: memref<1x16xf32, #tpu.memory_space<vmem>>, %arg4: memref<16x16xf32, #tpu.memory_space<vmem>>, %arg5: memref<1x16xf32, #tpu.memory_space<vmem>>, %arg6: memref<16x3xf32, #tpu.memory_space<vmem>>, %arg7: memref<1x3xf32, #tpu.memory_space<vmem>>, %arg8: memref<8x3xf32, #tpu.memory_space<vmem>>) attributes {dimension_semantics = [#tpu.dimension_semantics<parallel>], iteration_bounds = array<i64: 1>, scalar_prefetch = 0 : i64, scratch_operands = 0 : i64, tpu.core_type = #tpu.core_type<tc>, window_params = [{transform_indices = @transform_0, window_bounds = array<i64: 8, 32>}, {pipeline_mode = #tpu.pipeline_mode<synchronous>, transform_indices = @transform_1, window_bounds = array<i64: 32, 16>}, {pipeline_mode = #tpu.pipeline_mode<synchronous>, transform_indices = @transform_2, window_bounds = array<i64: 1, 16>}, {pipeline_mode = #tpu.pipeline_mode<synchronous>, transform_indices = @transform_3, window_bounds = array<i64: 16, 16>}, {pipeline_mode = #tpu.pipeline_mode<synchronous>, transform_indices = @transform_4, window_bounds = array<i64: 1, 16>}, {pipeline_mode = #tpu.pipeline_mode<synchronous>, transform_indices = @transform_5, window_bounds = array<i64: 16, 3>}, {pipeline_mode = #tpu.pipeline_mode<synchronous>, transform_indices = @transform_6, window_bounds = array<i64: 1, 3>}, {transform_indices = @transform_7, window_bounds = array<i64: 8, 3>}]} {
    %c0 = arith.constant 0 : index
    %c0_0 = arith.constant 0 : index
    %0 = vector.load %arg1[%c0, %c0_0] : memref<8x32xf32, #tpu.memory_space<vmem>>, vector<8x32xf32>
    %c0_1 = arith.constant 0 : index
    %c0_2 = arith.constant 0 : index
    %1 = vector.load %arg2[%c0_1, %c0_2] : memref<32x16xf32, #tpu.memory_space<vmem>>, vector<32x16xf32>
    %cst = arith.constant dense<0.000000e+00> : vector<8x16xf32>
    %2 = tpu.matmul %0, %1, %cst {dimension_numbers = #tpu.dot_dimension_numbers<[1], [0], [0], [1], [0, 0, 1, 1], [], []>} : vector<8x32xf32>, vector<32x16xf32>, vector<8x16xf32> -> vector<8x16xf32>
    %c0_3 = arith.constant 0 : index
    %c0_4 = arith.constant 0 : index
    %3 = vector.load %arg3[%c0_3, %c0_4] : memref<1x16xf32, #tpu.memory_space<vmem>>, vector<1x16xf32>
    %4 = vector.broadcast %3 : vector<1x16xf32> to vector<8x16xf32>
    %5 = arith.addf %2, %4 : vector<8x16xf32>
    %cst_5 = arith.constant 0.000000e+00 : f32
    %6 = vector.broadcast %cst_5 : f32 to vector<8x16xf32>
    %7 = arith.maximumf %5, %6 : vector<8x16xf32>
    %c0_6 = arith.constant 0 : index
    %c0_7 = arith.constant 0 : index
    %8 = vector.load %arg4[%c0_6, %c0_7] : memref<16x16xf32, #tpu.memory_space<vmem>>, vector<16x16xf32>
    %cst_8 = arith.constant dense<0.000000e+00> : vector<8x16xf32>
    %9 = tpu.matmul %7, %8, %cst_8 {dimension_numbers = #tpu.dot_dimension_numbers<[1], [0], [0], [1], [0, 0, 1, 1], [], []>} : vector<8x16xf32>, vector<16x16xf32>, vector<8x16xf32> -> vector<8x16xf32>
    %c0_9 = arith.constant 0 : index
    %c0_10 = arith.constant 0 : index
    %10 = vector.load %arg5[%c0_9, %c0_10] : memref<1x16xf32, #tpu.memory_space<vmem>>, vector<1x16xf32>
    %11 = vector.broadcast %10 : vector<1x16xf32> to vector<8x16xf32>
    %12 = arith.addf %9, %11 : vector<8x16xf32>
    %cst_11 = arith.constant 0.000000e+00 : f32
    %13 = vector.broadcast %cst_11 : f32 to vector<8x16xf32>
    %14 = arith.maximumf %12, %13 : vector<8x16xf32>
    %c0_12 = arith.constant 0 : index
    %c0_13 = arith.constant 0 : index
    %15 = vector.load %arg6[%c0_12, %c0_13] : memref<16x3xf32, #tpu.memory_space<vmem>>, vector<16x3xf32>
    %cst_14 = arith.constant dense<0.000000e+00> : vector<8x3xf32>
    %16 = tpu.matmul %14, %15, %cst_14 {dimension_numbers = #tpu.dot_dimension_numbers<[1], [0], [0], [1], [0, 0, 1, 1], [], []>} : vector<8x16xf32>, vector<16x3xf32>, vector<8x3xf32> -> vector<8x3xf32>
    %c0_15 = arith.constant 0 : index
    %c0_16 = arith.constant 0 : index
    %17 = vector.load %arg7[%c0_15, %c0_16] : memref<1x3xf32, #tpu.memory_space<vmem>>, vector<1x3xf32>
    %18 = vector.broadcast %17 : vector<1x3xf32> to vector<8x3xf32>
    %19 = arith.addf %16, %18 : vector<8x3xf32>
    %cst_17 = arith.constant dense<0xFF800000> : vector<8xf32>
    %20 = vector.multi_reduction <maximumf>, %19, %cst_17 [1] : vector<8x3xf32> to vector<8xf32>
    %21 = vector.shape_cast %20 : vector<8xf32> to vector<8x1xf32>
    %22 = vector.broadcast %21 : vector<8x1xf32> to vector<8x3xf32>
    %23 = arith.subf %19, %22 : vector<8x3xf32>
    %24 = math.exp %23 : vector<8x3xf32>
    %cst_18 = arith.constant dense<0.000000e+00> : vector<8xf32>
    %25 = vector.multi_reduction <add>, %24, %cst_18 [1] : vector<8x3xf32> to vector<8xf32>
    %26 = vector.shape_cast %25 : vector<8xf32> to vector<8x1xf32>
    %27 = vector.broadcast %26 : vector<8x1xf32> to vector<8x3xf32>
    %28 = arith.divf %24, %27 : vector<8x3xf32>
    %c0_19 = arith.constant 0 : index
    %c0_20 = arith.constant 0 : index
    %29 = vector.load %arg8[%c0_19, %c0_20] : memref<8x3xf32, #tpu.memory_space<vmem>>, vector<8x3xf32>
    tpu.vector_store %arg8[%c0_19, %c0_20], %28 {strides = array<i32>} : memref<8x3xf32, #tpu.memory_space<vmem>>, vector<8x3xf32>,
    return
  }
  func.func @transform_0(%arg0: i32) -> (i32, i32) {
    %c0_i32 = arith.constant 0 : i32
    %c0_i32_0 = arith.constant 0 : i32
    return %arg0, %c0_i32 : i32, i32
  }
  func.func @transform_1(%arg0: i32) -> (i32, i32) {
    %c0_i32 = arith.constant 0 : i32
    %c0_i32_0 = arith.constant 0 : i32
    %c0_i32_1 = arith.constant 0 : i32
    return %c0_i32, %c0_i32_0 : i32, i32
  }
  func.func @transform_2(%arg0: i32) -> (i32, i32) {
    %c0_i32 = arith.constant 0 : i32
    %c0_i32_0 = arith.constant 0 : i32
    %c0_i32_1 = arith.constant 0 : i32
    return %c0_i32, %c0_i32_0 : i32, i32
  }
  func.func @transform_3(%arg0: i32) -> (i32, i32) {
    %c0_i32 = arith.constant 0 : i32
    %c0_i32_0 = arith.constant 0 : i32
    %c0_i32_1 = arith.constant 0 : i32
    return %c0_i32, %c0_i32_0 : i32, i32
  }
  func.func @transform_4(%arg0: i32) -> (i32, i32) {
    %c0_i32 = arith.constant 0 : i32
    %c0_i32_0 = arith.constant 0 : i32
    %c0_i32_1 = arith.constant 0 : i32
    return %c0_i32, %c0_i32_0 : i32, i32
  }
  func.func @transform_5(%arg0: i32) -> (i32, i32) {
    %c0_i32 = arith.constant 0 : i32
    %c0_i32_0 = arith.constant 0 : i32
    %c0_i32_1 = arith.constant 0 : i32
    return %c0_i32, %c0_i32_0 : i32, i32
  }
  func.func @transform_6(%arg0: i32) -> (i32, i32) {
    %c0_i32 = arith.constant 0 : i32
    %c0_i32_0 = arith.constant 0 : i32
    %c0_i32_1 = arith.constant 0 : i32
    return %c0_i32, %c0_i32_0 : i32, i32
  }
  func.func @transform_7(%arg0: i32) -> (i32, i32) {
    %c0_i32 = arith.constant 0 : i32
    %c0_i32_0 = arith.constant 0 : i32
    return %arg0, %c0_i32 : i32, i32
  }
}

</mosaic_0001>

<bundles_post_ra>
// kernel: tpu_custom_call.1
= control target key start
LH: loop header
LB: loop body
LE: loop exit
PB: predicated region body
PF: predicated region fallthrough
CT: control target
= control target key end

     0   :  { %vm35_vm0 = vcmask 261120   ;;  %vm66_vm1 = vcmask 130048   ;;  %vm120_vm2 = vcmask 23552   ;;  %s242_s1 = inlined_call_operand.vmem [shape: f32[32,16], index: 1, kind: input, shape index: {}]   ;;  %s243_s2 = inlined_call_operand.vmem [shape: f32[1,16], index: 2, kind: input, shape index: {}]   ;;  %s244_s0 = inlined_call_operand.vmem [shape: f32[8,32], index: 0, kind: input, shape index: {}]   ;;  %s245_s4 = inlined_call_operand.vmem [shape: f32[1,16], index: 4, kind: input, shape index: {}]   ;;  %s246_s3 = inlined_call_operand.vmem [shape: f32[16,16], index: 3, kind: input, shape index: {}]   ;;  %s247_s6 = inlined_call_operand.vmem [shape: f32[1,3], index: 6, kind: input, shape index: {}]   ;;  %s248_s5 = inlined_call_operand.vmem [shape: f32[16,3], index: 5, kind: input, shape index: {}]   ;;  %s249_s7 = inlined_call_operand.vmem [shape: f32[8,3], index: 7, kind: output, shape index: {}]  }
   0x1   :  { %v30_v0 = vld [vmem:[%s242_s1 + $0x18] sm:$0xff]  ;;  %v29_v1 = vld [vmem:[%s242_s1 + $0x10] sm:$0xff]  ;;  %v28_v2 = vld [vmem:[%s242_s1 + $0x8] sm:$0xff] }
   0x2   :  { %51 = vmatpush.msra.mxu0 %v30_v0  ;;  %v27_v3 = vld [vmem:[%s242_s1] sm:$0xff]  ;;  %v61_v5 = vld [vmem:[%s246_s3 + $0x8] sm:$0xff] }
   0x3   :  { %v26_v4 = vld [vmem:[%s244_s0] sm:$0xff]  ;;  %84 = vmatpush.msra.mxu1 %v61_v5  ;;  %v92_v11 = vld [vmem:[%s248_s5 + $0x8] sm:$0xff] }
   0x4   :  { %52 = vmatpush.msra.mxu0 %v29_v1  ;;  %v60_v6 = vld [vmem:[%s246_s3] sm:$0xff]  ;;  %114 = vmatpush.msra.mxu2 %v92_v11 }
   0x5   :  { %85 = vmatpush.msra.mxu1 %v60_v6  ;;  %v153_v7 = vld [vmem:[%s243_s2] ss:$0 sm:$0xff] }
   0x6   :  { %53 = vmatpush.msra.mxu0 %v28_v2  ;;  %v91_v12 = vld [vmem:[%s248_s5] sm:$0xff] }
   0x7   :  { %115 = vmatpush.msra.mxu2 %v91_v12  ;;  %v154_v13 = vld [vmem:[%s245_s4] ss:$0 sm:$0xff] }
   0x8   :  { %54 = vmatpush.msra.mxu0 %v27_v3  ;;  %v155_v17 = vld [vmem:[%s247_s6] ss:$0 sm:$0xff] }
   0x9   :  { %150 = vmatmul.msk.f32.vlgmr.msra.gmra.mxu0 %vm35_vm0, %v26_v4 }
  0x86   :  { %v56_v8 = vpop.f32.mrf.mxu0 }
  0x87   :  { %v57_v9 = vadd.f32 %v153_v7, %v56_v8 }
  0x89   :  { %v59_v10 = vmax.f32 %v57_v9, 0.0 }
  0x8b   :  { %151 = vmatmul.msk.f32.vlgmr.msra.gmra.mxu1 %vm66_vm1, %v59_v10 }
 0x108   :  { %v87_v14 = vpop.f32.mrf.mxu1 }
 0x109   :  { %v88_v15 = vadd.f32 %v154_v13, %v87_v14 }
 0x10b   :  { %v90_v16 = vmax.f32 %v88_v15, 0.0 }
 0x10d   :  { %152 = vmatmul.msk.f32.vlgmr.msra.gmra.mxu2 %vm66_vm1, %v90_v16 }
 0x190   :  { %v117_v18 = vpop.f32.mrf.mxu2 }
 0x191   :  { %v118_v19 = vadd.f32 %v155_v17, %v117_v18 }
 0x193   :  { %v121_v20 = vsel %vm120_vm2, %v118_v19, -inf }
 0x194   :  { %122 = vmax.xlane.f32.xlu0 %v121_v20 }
 0x207   :  { %v123_v21 = vpop.xlane.xlu0 %122 }
 0x208   :  { %v124_v22 = vsub.f32 %v118_v19, %v123_v21 }
 0x20a   :  { %v125_v23 = vmul.f32 1.442695, %v124_v22 }
 0x20c   :  { %156 = vpow2.f32 %v125_v23 }
 0x212   :  { %v157_v24 = vpop.eup %156 }
 0x213   :  { %v127_v25 = vsel %vm120_vm2, %v157_v24, 0.0 }
 0x214   :  { %128 = vadd.xlane.f32.xlu0 %v127_v25 }
 0x287   :  { %v129_v26 = vpop.xlane.xlu0 %128 }
 0x288   :  { %158 = vrcp.f32 %v129_v26  ;;  %v141_v30 = vand.u32 2147483648, %v129_v26  ;;  %v139_v32 = vand.u32 2147483647, %v129_v26  ;;  %vm135_vm4 = vweird.f32 %v129_v26 }
 0x28a   :  { %v142_v34 = vor.u32 1.1754944e-38, %v141_v30  ;;  %vm140_vm6 = vcmp.eq.f32.partialorder %v139_v32, 8.507059e+37 }
 0x28e   :  { %v159_v27 = vpop.eup %158 }
 0x28f   :  { %v131_v28 = vmul.f32 %v159_v27, %v129_v26  ;;  %vm136_vm3 = vweird.f32 %v159_v27 }
 0x290   :  { %vm137_vm5 = vmor %vm135_vm4, %vm136_vm3 }
 0x291   :  { %v132_v29 = vsub.f32 1.0, %v131_v28 }
 0x293   :  { %v133_v31 = vmul.f32 %v159_v27, %v132_v29 }
 0x295   :  { %v134_v33 = vadd.f32 %v159_v27, %v133_v31 }
 0x297   :  { %v138_v35 = vsel %vm137_vm5, %v159_v27, %v134_v33 }
 0x298   :  { %v143_v36 = vsel %vm140_vm6, %v142_v34, %v138_v35 }
 0x299   :  { %v144_v37 = vmul.f32 %v157_v24, %v143_v36 }
 0x29b   :  { %145 = vst.msk [vmem:[%s249_s7] sm:$0xff] %vm120_vm2, %v144_v37 }

</bundles_post_ra>
